<compile_context>
chip_gen: v7x
topology: tpu7x:2x2x1
jax: 0.10.0
libtpu: 0.0.40
codegen_flags: <defaults>
</compile_context>

<pallas_src>
import jax
import jax.numpy as jnp
from jax import lax
from jax.experimental import pallas as pl
from jax.experimental.pallas import tpu as pltpu


def _round_up(a, b):
    return pl.cdiv(a, b) * b


def _ce_more_to_more_kernel(onehot_ref, x_ref, out_ref):
    # onehot_ref: (G_pad, tile_c) f32  -- grid-invariant along p, tiled along c
    # x_ref:      (tile_p, tile_c) f32 -- logits tile
    # out_ref:    (G_pad, tile_p) f32  -- resident across the c axis (accumulator)
    c = pl.program_id(1)

    x = x_ref[...].astype(jnp.float32)
    # BCEWithLogits(x, t) = max(x, 0) - x*t + log1p(exp(-|x|)) = softplus(x) - x*t
    sp = jnp.maximum(x, 0.0) + jnp.log1p(jnp.exp(-jnp.abs(x)))

    dn = (((1,), (1,)), ((), ()))  # contract last dims of both operands (no .T copy)
    ones = jnp.ones(onehot_ref.shape, jnp.float32)
    row_sum = lax.dot_general(ones, sp, dn,
                              preferred_element_type=jnp.float32)        # (G_pad, tile_p)
    gathered = lax.dot_general(onehot_ref[...], x, dn,
                               preferred_element_type=jnp.float32)       # (G_pad, tile_p)
    partial = row_sum - gathered

    @pl.when(c == 0)
    def _():
        out_ref[...] = partial

    @pl.when(c != 0)
    def _():
        out_ref[...] += partial


def cross_entropy_more_to_more(gt_kind_ind, pre_cls, *, tile_p=None, tile_c=None):
    """gt_kind_ind: (G,) int, pre_cls: (P, C) float -> (G, P) float32."""
    G = int(gt_kind_ind.shape[0])
    P, C = (int(s) for s in pre_cls.shape)

    G_pad = max(8, _round_up(G, 8))
    C_pad = max(128, _round_up(C, 128))

    # --- class tile: keep the whole (padded) class axis unless it is huge ----
    if tile_c is None:
        tile_c = min(C_pad, 2048)
    tile_c = max(128, min(_round_up(tile_c, 128), C_pad))
    C_pad = _round_up(C_pad, tile_c)

    # --- prediction tile: largest multiple of 128 under a VMEM budget --------
    # double-buffered x tile = 2 * tile_p * tile_c * 4 B; ~12 MiB budget keeps
    # total VMEM well inside v7x's 64 MiB and v5e's scoped default.
    if tile_p is None:
        budget = 12 * 1024 * 1024
        tile_p = (budget // (2 * tile_c * 4)) // 128 * 128
        tile_p = int(min(max(tile_p, 128), 2048))
    tile_p = max(128, min(_round_up(tile_p, 128), _round_up(P, 128)))
    n128 = _round_up(P, 128) // 128
    if n128 >= 2:  # keep >= 2 P-steps so both v7x TensorCores get work
        tile_p = min(tile_p, max(128, (n128 // 2) * 128))
    P_pad = _round_up(P, tile_p)

    # --- pad inputs so every block is lane/sublane-dense ---------------------
    x = pre_cls.astype(jnp.float32)
    # padded classes get very negative logits -> softplus contributes exactly 0
    x = jnp.pad(x, ((0, 0), (0, C_pad - C)), constant_values=-1e30)
    x = jnp.pad(x, ((0, P_pad - P), (0, 0)))                        # (P_pad, C_pad)

    # one-hot targets precomputed once (grid-invariant input, VMEM-resident)
    onehot = jax.nn.one_hot(gt_kind_ind.astype(jnp.int32), C_pad,
                            dtype=jnp.float32)                      # (G, C_pad)
    onehot = jnp.pad(onehot, ((0, G_pad - G), (0, 0)))              # (G_pad, C_pad)

    grid = (P_pad // tile_p, C_pad // tile_c)

    out = pl.pallas_call(
        _ce_more_to_more_kernel,
        out_shape=jax.ShapeDtypeStruct((G_pad, P_pad), jnp.float32),
        grid_spec=pltpu.PrefetchScalarGridSpec(
            num_scalar_prefetch=0,
            grid=grid,
            in_specs=[
                pl.BlockSpec((G_pad, tile_c), lambda p, c: (0, c)),   # one-hot
                pl.BlockSpec((tile_p, tile_c), lambda p, c: (p, c)),  # logits
            ],
            out_specs=pl.BlockSpec((G_pad, tile_p), lambda p, c: (0, p)),
        ),
        compiler_params=pltpu.CompilerParams(
            dimension_semantics=("parallel", "arbitrary"),
            vmem_limit_bytes=48 * 1024 * 1024),
    )(onehot, x)

    return out[:G, :P]


def _reference(gt_kind_ind, pre_cls):
    # pure-JAX reference mirroring the PyTorch loop exactly
    P, C = pre_cls.shape
    target = jax.nn.one_hot(gt_kind_ind, C, dtype=jnp.float32)          # (G, C)
    x = pre_cls.astype(jnp.float32)[None, :, :]                         # (1, P, C)
    t = target[:, None, :]                                              # (G, 1, C)
    loss = jnp.maximum(x, 0.0) - x * t + jnp.log1p(jnp.exp(-jnp.abs(x)))
    return loss.sum(axis=-1)                                            # (G, P)


if __name__ == "__main__":
    key = jax.random.PRNGKey(0)
    k1, k2, k3, k4 = jax.random.split(key, 4)

    # aligned shapes
    G, P, C = 8, 256, 128
    gt = jax.random.randint(k1, (G,), 0, C, dtype=jnp.int32)
    x = jax.random.normal(k2, (P, C), dtype=jnp.float32) * 2.0
    out = jax.block_until_ready(cross_entropy_more_to_more(gt, x))
    ref = _reference(gt, x)
    assert out.shape == (G, P)
    assert jnp.allclose(out, ref, atol=1e-3, rtol=1e-4), (
        float(jnp.max(jnp.abs(out - ref))))

    # ragged shapes (exercise the G / P / C padding paths)
    G2, P2, C2 = 5, 200, 80
    gt2 = jax.random.randint(k3, (G2,), 0, C2, dtype=jnp.int32)
    x2 = jax.random.normal(k4, (P2, C2), dtype=jnp.float32) * 2.0
    out2 = jax.block_until_ready(cross_entropy_more_to_more(gt2, x2))
    ref2 = _reference(gt2, x2)
    assert out2.shape == (G2, P2)
    assert jnp.allclose(out2, ref2, atol=1e-3, rtol=1e-4), (
        float(jnp.max(jnp.abs(out2 - ref2))))

    print("KERNEL_OK")
</pallas_src>

<mosaic_0001>
module attributes {stable_mosaic.version = 11 : i64} {
  func.func @_ce_more_to_more_kernel(%arg0: i32, %arg1: i32, %arg2: memref<8x128xf32, #tpu.memory_space<vmem>>, %arg3: memref<128x128xf32, #tpu.memory_space<vmem>>, %arg4: memref<8x128xf32, #tpu.memory_space<vmem>>) attributes {dimension_semantics = [#tpu.dimension_semantics<parallel>, #tpu.dimension_semantics<arbitrary>], iteration_bounds = array<i64: 2, 1>, scalar_prefetch = 0 : i64, scratch_operands = 0 : i64, tpu.core_type = #tpu.core_type<tc>, window_params = [{transform_indices = @transform_0, window_bounds = array<i64: 8, 128>}, {transform_indices = @transform_1, window_bounds = array<i64: 128, 128>}, {transform_indices = @transform_2, window_bounds = array<i64: 8, 128>}]} {
    %c0 = arith.constant 0 : index
    %c0_0 = arith.constant 0 : index
    %0 = vector.load %arg3[%c0, %c0_0] : memref<128x128xf32, #tpu.memory_space<vmem>>, vector<128x128xf32>
    %cst = arith.constant 0.000000e+00 : f32
    %1 = vector.broadcast %cst : f32 to vector<128x128xf32>
    %2 = arith.maximumf %0, %1 : vector<128x128xf32>
    %3 = math.absf %0 : vector<128x128xf32>
    %cst_1 = arith.constant 0.000000e+00 : f32
    %4 = vector.broadcast %cst_1 : f32 to vector<128x128xf32>
    %5 = arith.subf %4, %3 : vector<128x128xf32>
    %6 = math.exp %5 : vector<128x128xf32>
    %7 = math.log1p %6 : vector<128x128xf32>
    %8 = arith.addf %2, %7 : vector<128x128xf32>
    %cst_2 = arith.constant 1.000000e+00 : f32
    %9 = vector.broadcast %cst_2 : f32 to vector<8x128xf32>
    %cst_3 = arith.constant dense<0.000000e+00> : vector<8x128xf32>
    %10 = tpu.matmul %9, %8, %cst_3 {dimension_numbers = #tpu.dot_dimension_numbers<[1], [1], [0], [0], [0, 0, 1, 0], [], []>} : vector<8x128xf32>, vector<128x128xf32>, vector<8x128xf32> -> vector<8x128xf32>
    %c0_4 = arith.constant 0 : index
    %c0_5 = arith.constant 0 : index
    %11 = vector.load %arg2[%c0_4, %c0_5] : memref<8x128xf32, #tpu.memory_space<vmem>>, vector<8x128xf32>
    %cst_6 = arith.constant dense<0.000000e+00> : vector<8x128xf32>
    %12 = tpu.matmul %11, %0, %cst_6 {dimension_numbers = #tpu.dot_dimension_numbers<[1], [1], [0], [0], [0, 0, 1, 0], [], []>} : vector<8x128xf32>, vector<128x128xf32>, vector<8x128xf32> -> vector<8x128xf32>
    %13 = arith.subf %10, %12 : vector<8x128xf32>
    %c0_i32 = arith.constant 0 : i32
    %14 = arith.cmpi eq, %arg1, %c0_i32 : i32
    %15 = arith.extui %14 : i1 to i32
    %c0_i32_7 = arith.constant 0 : i32
    %16 = arith.cmpi ne, %15, %c0_i32_7 : i32
    scf.if %16 {
      %c0_10 = arith.constant 0 : index
      %c0_11 = arith.constant 0 : index
      %20 = vector.load %arg4[%c0_10, %c0_11] : memref<8x128xf32, #tpu.memory_space<vmem>>, vector<8x128xf32>
      tpu.vector_store %arg4[%c0_10, %c0_11], %13 {strides = array<i32>} : memref<8x128xf32, #tpu.memory_space<vmem>>, vector<8x128xf32>,
    } else {
    }
    %c0_i32_8 = arith.constant 0 : i32
    %17 = arith.cmpi ne, %arg1, %c0_i32_8 : i32
    %18 = arith.extui %17 : i1 to i32
    %c0_i32_9 = arith.constant 0 : i32
    %19 = arith.cmpi ne, %18, %c0_i32_9 : i32
    scf.if %19 {
      %c0_10 = arith.constant 0 : index
      %c0_11 = arith.constant 0 : index
      %20 = vector.load %arg4[%c0_10, %c0_11] : memref<8x128xf32, #tpu.memory_space<vmem>>, vector<8x128xf32>
      %21 = arith.addf %20, %13 : vector<8x128xf32>
      %c0_12 = arith.constant 0 : index
      %c0_13 = arith.constant 0 : index
      %22 = vector.load %arg4[%c0_12, %c0_13] : memref<8x128xf32, #tpu.memory_space<vmem>>, vector<8x128xf32>
      tpu.vector_store %arg4[%c0_12, %c0_13], %21 {strides = array<i32>} : memref<8x128xf32, #tpu.memory_space<vmem>>, vector<8x128xf32>,
    } else {
    }
    return
  }
  func.func @transform_0(%arg0: i32, %arg1: i32) -> (i32, i32) {
    %c0_i32 = arith.constant 0 : i32
    %c0_i32_0 = arith.constant 0 : i32
    return %c0_i32, %arg1 : i32, i32
  }
  func.func @transform_1(%arg0: i32, %arg1: i32) -> (i32, i32) {
    %c0_i32 = arith.constant 0 : i32
    return %arg0, %arg1 : i32, i32
  }
  func.func @transform_2(%arg0: i32, %arg1: i32) -> (i32, i32) {
    %c0_i32 = arith.constant 0 : i32
    %c0_i32_0 = arith.constant 0 : i32
    return %c0_i32, %arg0 : i32, i32
  }
}

</mosaic_0001>

<bundles_post_ra>
// kernel: tpu_custom_call.1
= control target key start
LH: loop header
LB: loop body
LE: loop exit
PB: predicated region body
PF: predicated region fallthrough
CT: control target
= control target key end

     0   :  { %7 = vsyncpa [#allocation3], 0  ;;  %s1685_s0 = inlined_call_operand.hbm [shape: f32[8,128], index: 0, kind: input, shape index: {}]   ;;  %s1686_s1 = inlined_call_operand.hbm [shape: f32[256,128], index: 1, kind: input, shape index: {}]   ;;  %s1687_s2 = inlined_call_operand.hbm [shape: f32[8,256], index: 2, kind: output, shape index: {}]  }
   0x1   :  { %8 = vsyncpa [#allocation6], 0 }
   0x2   :  { %10 = vsyncpa [#allocation6 + $0x1], 0 }
   0x3   :  { %11 = vsyncpa [#allocation4], 0 }
   0x4   :  { %13 = vsyncpa [#allocation4 + $0x1], 0  ;;  %s1198_s9 = smov 0   ;;  %s1200_s10 = smov 0  }
   0x5   :  { %s1202_s11 = smov 0   ;;  %s1204_s12 = smov 0  }
   0x6   :  { %s1206_s13 = smov 0   ;;  %s1208_s14 = smov 0  }
   0x7 LB: > { %s716_s15 = sadd.s32 4294967295, %s1172_s14   ;;  %s717_s16 = sadd.s32 4294967294, %s1172_s14   ;;  %s1172_s14 = sphi %s1208_s14, %s19_s14   ;;  %s1168_s13 = sphi %s1206_s13, %s1739_s13   ;;  %s1164_s12 = sphi %s1204_s12, %s1738_s12   ;;  %s1160_s11 = sphi %s1202_s11, %s1737_s11   ;;  %s1156_s10 = sphi %s1200_s10, %s1736_s10   ;;  %s1152_s9 = sphi %s1198_s9, %s1735_s9  }
   0x8   : > { %s66_s17 = sadd.s32 1, %s1160_s11  ;;  %p73_p0 = scmp.ne.s32.totalorder %s1160_s11, %s1156_s10 }
   0x9   : > { %p74_p1 = scmp.eq.s32.totalorder %s1172_s14, 0  ;;  %p79_p2 = scmp.ne.s32.totalorder %s1156_s10, %s1152_s9 }
   0xa   : > { %p1236_p3 = scmp.eq.s32.totalorder %s716_s15, 0  ;;  %p103_p4 = scmp.eq.s32.totalorder %s716_s15, 1 }
   0xb   : > { %p1240_p5 = por %p74_p1, %p73_p0  ;;  %p109_p6 = scmp.eq.s32.totalorder %s717_s16, 1 }
   0xc   : > { %s1694_s18 = scalar_select %p1236_p3, 1, 0 }
   0xd   : > { %p1246_p7 = por %p1236_p3, %p79_p2  ;;  %p1250_p8 = por %p103_p4, %p73_p0 }
   0xe   : > { %p1254_p9 = por %p109_p6, %p79_p2  ;;  %p718_p10 = scmp.ge.s32.totalorder %s1172_s14, 1 }
   0xf   : > { %s1696_s20 = scalar_select %p1246_p7, 1, 0 }
  0x10   : > { %s1697_s21 = scalar_select %p1250_p8, 1, 0 }
  0x11   : > { %s1698_s22 = scalar_select %p1254_p9, 1, 0 }
  0x12   : > { %p116_p11 = scmp.lt.s32.totalorder %s1172_s14, 3  ;;  %s1174_s24 = smov [#allocation2]  }
  0x13   : > { %s131_s25 = sshll.u32 %s1174_s24, 4  ;;  %p906_p1 = scmp.lt.s32.totalorder %s1172_s14, 2  ;;  %s132_s25 = int_to_ptr.vmem [resolvable:$true] %s131_s25 }
  0x14   : > { %p1261_p13 = pnand %p718_p10, %p116_p11  ;;  %s31_s28 = sadd.s32 1, %s1168_s13 }
  0x15   : > { %p1270_p4 = pnand %p906_p1, %p1240_p5  ;;  %p1281_p6 = scmp.ge.s32.totalorder %s31_s28, 2 }
  0x16   : > { %s1699_s23 = scalar_select %p1261_p13, 1, 0 }
  0x17   : > { %p893_p0 = pneg %p1261_p13  ;;  %s142_s30 = sand.u32 1, %s1160_s11  }
  0x18   : > { %s1700_s26 = scalar_select %p1270_p4, 1, 0 }
  0x19   : > { %p1276_p2 = pnand %p893_p0, %p1236_p3  ;;  %s1028_s5 = scalar_lea.hbm %s1685_s0, 128 }
  0x1a   : > { %s1702_s29 = scalar_select %p1281_p6, 1, 0 }
  0x1b   : > { %p1029_p5 = scmp.ne.s32.totalorder %s1685_s0, %s1028_s5  ;;  %p1030_p10 = pneg %p1276_p2 }
  0x1c   : > { %p1035_p0 = scmp.lt.u32.totalorder %s1028_s5, %s1685_s0 }
  0x1d   : > { %p1031_p11 = pnand %p1030_p10, %p1029_p5 }
  0x1f   : > { %p1032_p1 = pneg %p1031_p11 }
  0x21   : > { %p1037_p12 = pnand %p1035_p0, %p1032_p1 }
  0x23   : > { %1040 = shalt.err (!%p1037_p12)
}
  0x24   : > { %s1041_s16 = scalar_lea.vmem %s132_s25, 128  ;;  %p1049_p3 = scmp.lt.s32.totalorder %s132_s25, %s132_s25 }
  0x25   : > { %p1042_p9 = scmp.ne.s32.totalorder %s132_s25, %s1041_s16  ;;  %p1050_p13 = scmp.lt.s32.totalorder %s1041_s16, %s1041_s16 }
  0x27   : > { %p1044_p8 = pnand %p1042_p9, %p1030_p10  ;;  %p1051_p4 = por %p1050_p13, %p1049_p3 }
  0x29   : > { %p1045_p7 = pneg %p1044_p8 }
  0x2b   : > { %p1052_p6 = pnand %p1051_p4, %p1045_p7 }
  0x2d   : > { %1055 = shalt.err (!%p1052_p6)
}
  0x2e   : > { %896 = dma.hbm_to_vmem [thread:$0]  (!%p1276_p2), %s1685_s0, 128, %s132_s25, [#allocation3]  }
  0x2f   : > { %p1703_p9 = scmp.ne.s32.totalorder %s1702_s29, 0  ;;  %s721_s3 = sshll.u32 %s142_s30, 7 }
  0x30   : > { %s732_s5 = sshll.u32 %s1168_s13, 11  ;;  %s146_s8 = scalar_lea.vmem [#allocation5], %s721_s3 }
  0x31   : > { %s1741_s28 = smov (%p1703_p9, %s31_s28), 0  ;;  %s1312_s7 = scalar_lea.hbm %s1686_s1, %s732_s5 }
  0x32   : > { %s61_s4 = ssub.s32 %s1168_s13, %s1741_s28  ;;  %s154_s15 = sshll.u32 %s146_s8, 4  ;;  %s1319_s15 = int_to_ptr.vmem [resolvable:$true] %s154_s15 }
  0x33   : > { %p64_p3 = scmp.eq.s32.totalorder %s61_s4, 0  ;;  %s1321_s29 = scalar_lea.sflag [#allocation6], %s142_s30 }
  0x34   : > { %s1056_s16 = scalar_lea.hbm %s1312_s7, 2048  ;;  %p1704_p8 = scmp.ne.s32.totalorder %s1700_s26, 0 }
  0x35   : > { %s1317_s25 = scalar_select %p64_p3, %s1160_s11, %s66_s17  }
  0x36   : > { %p1057_p7 = scmp.ne.s32.totalorder %s1312_s7, %s1056_s16  ;;  %p1058_p12 = pneg %p1704_p8 }
  0x37   : > { %s1061_s3 = scalar_lea.hbm %s1686_s1, 4096  ;;  %p1062_p2 = scmp.lt.u32.totalorder %s1312_s7, %s1686_s1 }
  0x38   : > { %p1059_p13 = pnand %p1058_p12, %p1057_p7  ;;  %p1063_p6 = scmp.lt.u32.totalorder %s1061_s3, %s1056_s16 }
  0x39   : > { %p1065_p10 = scmp.lt.u32.totalorder %s1056_s16, %s1312_s7 }
  0x3a   : > { %p1060_p4 = pneg %p1059_p13  ;;  %p1064_p5 = por %p1063_p6, %p1062_p2 }
  0x3c   : > { %p1066_p11 = por %p1065_p10, %p1064_p5 }
  0x3e   : > { %p1067_p1 = pnand %p1066_p11, %p1060_p4 }
  0x40   : > { %1070 = shalt.err (!%p1067_p1)
}
  0x41   : > { %s1071_s17 = scalar_lea.vmem %s1319_s15, 2048  ;;  %s1175_s30 = smov [#allocation5]  }
  0x42   : > { %p1072_p0 = scmp.ne.s32.totalorder %s1319_s15, %s1071_s17  ;;  %s1076_s27 = sshll.u32 %s1175_s30, 4  ;;  %s1077_s27 = int_to_ptr.vmem [resolvable:$false] %s1076_s27 }
  0x43   : > { %s1078_s6 = scalar_lea.vmem %s1077_s27, 4096  ;;  %p1079_p7 = scmp.lt.s32.totalorder %s1319_s15, %s1077_s27 }
  0x44   : > { %p1074_p9 = pnand %p1072_p0, %p1058_p12  ;;  %p1080_p13 = scmp.lt.s32.totalorder %s1078_s6, %s1071_s17 }
  0x46   : > { %p1075_p3 = pneg %p1074_p9  ;;  %p1081_p2 = por %p1080_p13, %p1079_p7 }
  0x48   : > { %p1082_p6 = pnand %p1081_p2, %p1075_p3 }
  0x4a   : > { %1085 = shalt.err (!%p1082_p6)
}
  0x4b   : > { %s1176_s8 = smov 128   ;;  %s1177_s16 = smov 8  }
  0x4c   : > { %900 = dma.hbm_to_vmem [thread:$0]  (!%p1704_p8), %s1312_s7, 2048, %s1319_s15, %s1321_s29, %s1176_s8, %s1176_s8, %s1177_s16  }
  0x4d   : > { %p1705_p12 = scmp.ne.s32.totalorder %s1699_s23, 0 }
  0x4e   : > { %p1706_p4 = scmp.ne.s32.totalorder (!%p1705_p12), %s1694_s18, 0 }
  0x4f   : > { %166 = sbr.rel (%p1705_p12) target bundleno = 421 (0x1a5), region = 28 }
  0x56   : > { %1139 = dma.done.wait (%p1706_p4), [#allocation3], 128  }
  0x57   : > { %1141 = vsyncadd (%p1706_p4), [#allocation3], 4294967168  ;;  %s1356_s19 = sand.u32 1, %s1156_s10   ;;  %p1707_p8 = scmp.ne.s32.totalorder %s1696_s20, 0 }
  0x58   : > { %s726_s24 = sshll.u32 %s1356_s19, 7  ;;  %s173_s3 = scalar_lea.sflag [#allocation6], %s1356_s19 }
  0x59   : > { %s1360_s4 = scalar_lea.vmem [#allocation5], %s726_s24 }
  0x5a   : > { %1143 = dma.done.wait (%p1707_p8), %s173_s3, 2048  }
  0x5b   : > { %1145 = vsyncadd (%p1707_p8), %s173_s3, 4294965248  ;;  %v1178_v0 = vmov 0.0|0.0   ;;  %vm1179_vm0 = vmmov 0   ;;  %v1180_v1 = vmov 0.0   ;;  %v1369_v2 = vld [vmem:[%s1360_s4] sm:$0xff]  ;;  %v1372_v3 = vld [vmem:[%s1360_s4 + $0x8] sm:$0xff] }
  0x5c   : > { %861 = vmatprep.subr.bf16.mxu1 %v1178_v0  ;;  %837 = vmatprep.subr.bf16.mxu0 %v1178_v0  ;;  %v1375_v4 = vld [vmem:[%s1360_s4 + $0x10] sm:$0xff]  ;;  %v230_v5 = vand.u32 2147483647, %v1369_v2  ;;  %v231_v6 = vand.u32 2147483647, %v1372_v3  ;;  %v862_v7 = vpack.c.bf16 %v1372_v3, %v1369_v2  ;;  %v1382_v8 = vld [vmem:[%s1360_s4 + $0x18] sm:$0xff] }
  0x5d   : > { %834 = vmatprep.mubr.msk.f32.mxu1 %vm1179_vm0, %v1180_v1  ;;  %799 = vmatprep.mubr.msk.f32.mxu0 %vm1179_vm0, %v1180_v1  ;;  %v232_v9 = vand.u32 2147483647, %v1375_v4  ;;  %v233_v10 = vand.u32 2147483647, %v1382_v8  ;;  %v1387_v11 = vld [vmem:[%s1360_s4 + $0x20] sm:$0xff]  ;;  %v1390_v14 = vld [vmem:[%s1360_s4 + $0x28] sm:$0xff]  ;;  %v865_v27 = vpack.c.bf16 %v1382_v8, %v1375_v4 }
  0x5e   : > { %v246_v12 = vsub.f32 0.0, %v230_v5  ;;  %v247_v13 = vsub.f32 0.0, %v231_v6  ;;  %863 = vmatpush3.bf16.xpose.msra.mxu1 %v862_v7  ;;  %v1393_v15 = vld [vmem:[%s1360_s4 + $0x30] sm:$0xff]  ;;  %v234_v18 = vand.u32 2147483647, %v1387_v11  ;;  %v1399_v22 = vld [vmem:[%s1360_s4 + $0x38] sm:$0xff]  ;;  %v868_v40 = vpack.c.bf16 %v1390_v14, %v1387_v11 }
  0x5f   : > { %864 = vmatprep.subr.bf16.mxu1 %v1178_v0  ;;  %v248_v16 = vsub.f32 0.0, %v232_v9  ;;  %v249_v17 = vsub.f32 0.0, %v233_v10  ;;  %v235_v19 = vand.u32 2147483647, %v1390_v14  ;;  %v236_v28 = vand.u32 2147483647, %v1393_v15 }
  0x60   : > { %v262_v20 = vmul.f32 1.442695, %v246_v12  ;;  %v264_v21 = vmul.f32 1.442695, %v247_v13  ;;  %v250_v25 = vsub.f32 0.0, %v234_v18  ;;  %v1406_v34 = vld [vmem:[%s1360_s4 + $0x40] sm:$0xff]  ;;  %v871_v63 = vpack.c.bf16 %v1399_v22, %v1393_v15 }
  0x61   : > { %v266_v23 = vmul.f32 1.442695, %v248_v16  ;;  %v268_v24 = vmul.f32 1.442695, %v249_v17  ;;  %v251_v26 = vsub.f32 0.0, %v235_v19  ;;  %v252_v32 = vsub.f32 0.0, %v236_v28 }
  0x62   : > { %964 = vpow2.f32 %v262_v20  ;;  %v237_v29 = vand.u32 2147483647, %v1399_v22  ;;  %v270_v30 = vmul.f32 1.442695, %v250_v25  ;;  %v1409_v35 = vld [vmem:[%s1360_s4 + $0x48] sm:$0xff]  ;;  %v1417_v41 = vld [vmem:[%s1360_s4 + $0x50] sm:$0xff] }
  0x63   : > { %966 = vpow2.f32 %v264_v21  ;;  %v272_v31 = vmul.f32 1.442695, %v251_v26  ;;  %v274_v36 = vmul.f32 1.442695, %v252_v32  ;;  %v238_v37 = vand.u32 2147483647, %v1406_v34 }
  0x64   : > { %968 = vpow2.f32 %v266_v23  ;;  %v253_v33 = vsub.f32 0.0, %v237_v29  ;;  %v239_v39 = vand.u32 2147483647, %v1409_v35  ;;  %v240_v49 = vand.u32 2147483647, %v1417_v41  ;;  %v1433_v56 = vld [vmem:[%s1360_s4 + $0x58] sm:$0xff] }
  0x65   : > { %970 = vpow2.f32 %v268_v24  ;;  %v254_v43 = vsub.f32 0.0, %v238_v37  ;;  %v214_v53 = vmax.f32 %v1369_v2, 0.0  ;;  %v215_v61 = vmax.f32 %v1372_v3, 0.0  ;;  %v1450_v17 = vld [vmem:[%s1360_s4 + $0x60] sm:$0xff]  ;;  %s727_s18 = sshll.u32 %s1356_s19, 3  ;;  %s729_s20 = sshll.u32 %s1164_s12, 7 }
  0x66   : > { %866 = vmatpush3.bf16.xpose.msra.mxu1 %v865_v27  ;;  %972 = vpow2.f32 %v270_v30  ;;  %v276_v38 = vmul.f32 1.442695, %v253_v33  ;;  %v255_v46 = vsub.f32 0.0, %v239_v39  ;;  %v216_v62 = vmax.f32 %v1375_v4, 0.0  ;;  %s196_s23 = scalar_lea.vmem [#allocation7], %s727_s18  ;;  %s1636_s29 = scalar_lea.hbm %s1687_s2, %s729_s20 }
  0x67   : > { %867 = vmatprep.subr.bf16.mxu1 %v1178_v0  ;;  %974 = vpow2.f32 %v272_v31  ;;  %v278_v55 = vmul.f32 1.442695, %v254_v43  ;;  %v256_v1 = vsub.f32 0.0, %v240_v49  ;;  %v241_v7 = vand.u32 2147483647, %v1433_v56  ;;  %s622_s26 = sshll.u32 %s196_s23, 4  ;;  %s1638_s26 = int_to_ptr.vmem [resolvable:$true] %s622_s26 }
  0x68   : > { %976 = vpow2.f32 %v274_v36  ;;  %v280_v59 = vmul.f32 1.442695, %v255_v46  ;;  %v217_v10 = vmax.f32 %v1382_v8, 0.0  ;;  %v874_v20 = vpack.c.bf16 %v1409_v35, %v1406_v34  ;;  %s609_s5 = scalar_lea.sflag [#allocation4], %s1356_s19  ;;  %s1086_s17 = scalar_lea.vmem %s1638_s26, 128 }
  0x69   : > { %978 = vpow2.f32 %v276_v38  ;;  %v282_v21 = vmul.f32 1.442695, %v256_v1  ;;  %v257_v25 = vsub.f32 0.0, %v241_v7  ;;  %v877_v26 = vpack.c.bf16 %v1433_v56, %v1417_v41  ;;  %p1087_p5 = scmp.ne.s32.totalorder %s1638_s26, %s1086_s17  ;;  %p1732_p10 = scmp.ne.s32.totalorder %s1697_s21, 0 }
  0x6a   : > { %v242_v30 = vand.u32 2147483647, %v1450_v17  ;;  %v218_v4 = vmax.f32 %v1387_v11, 0.0  ;;  %s1182_s12 = smov [#allocation7]  }
  0x6b   : > { %p1088_p11 = pnand %p1087_p5, %p1732_p10  ;;  %s1090_s30 = sshll.u32 %s1182_s12, 4  ;;  %s1091_s30 = int_to_ptr.vmem [resolvable:$false] %s1090_s30 }
  0x6c   : > { %v965_v42 = vpop.eup %964  ;;  %s1092_s27 = scalar_lea.vmem %s1091_s30, 256  ;;  %p1093_p0 = scmp.lt.s32.totalorder %s1638_s26, %s1091_s30 }
  0x6d   : > { %v1419_v44 = vpop.eup %966  ;;  %v294_v45 = vadd.f32 1.0, %v965_v42  ;;  %v297_v54 = vmul.f32 -0.5, %v965_v42  ;;  %v300_v3 = vand.u32 2147483647, %v965_v42  ;;  %p1089_p1 = pneg %p1088_p11  ;;  %p1094_p9 = scmp.lt.s32.totalorder %s1092_s27, %s1086_s17 }
  0x6e   : > { %v1421_v47 = vpop.eup %968  ;;  %v303_v48 = vadd.f32 1.0, %v1419_v44  ;;  %869 = vmatpush3.bf16.xpose.msra.mxu1 %v868_v40  ;;  %v306_v57 = vmul.f32 -0.5, %v1419_v44  ;;  %v309_v19 = vand.u32 2147483647, %v1419_v44 }
  0x6f   : > { %v1425_v50 = vpop.eup %970  ;;  %980 = vlog2.f32 %v294_v45  ;;  %v312_v51 = vadd.f32 1.0, %v1421_v47  ;;  %870 = vmatprep.subr.bf16.mxu1 %v1178_v0  ;;  %v315_v5 = vmul.f32 -0.5, %v1421_v47  ;;  %v298_v9 = vadd.f32 1.0, %v297_v54  ;;  %p1095_p3 = por %p1094_p9, %p1093_p0 }
  0x70   : > { %v1429_v52 = vpop.eup %972  ;;  %982 = vlog2.f32 %v303_v48  ;;  %v321_v58 = vadd.f32 1.0, %v1425_v50  ;;  %v324_v12 = vmul.f32 -0.5, %v1425_v50  ;;  %v307_v13 = vadd.f32 1.0, %v306_v57 }
  0x71   : > { %984 = vlog2.f32 %v312_v51  ;;  %v1437_v60 = vpop.eup %974  ;;  %v330_v6 = vadd.f32 1.0, %v1429_v52  ;;  %v316_v24 = vadd.f32 1.0, %v315_v5  ;;  %v299_v27 = vmul.f32 %v965_v42, %v298_v9  ;;  %p1096_p7 = pnand %p1095_p3, %p1089_p1 }
  0x72   : > { %986 = vlog2.f32 %v321_v58  ;;  %v339_v16 = vadd.f32 1.0, %v1437_v60  ;;  %v1452_v18 = vpop.eup %976  ;;  %v318_v28 = vand.u32 2147483647, %v1421_v47  ;;  %v325_v29 = vadd.f32 1.0, %v324_v12 }
  0x73   : > { %988 = vpow2.f32 %v278_v55  ;;  %v1457_v23 = vpop.eup %978  ;;  %vm1464_vm1 = vcmp.lt.f32.partialorder %v300_v3, 0.0004427343  ;;  %v308_v33 = vmul.f32 %v1419_v44, %v307_v13  ;;  %v327_v36 = vand.u32 2147483647, %v1425_v50 }
  0x74   : > { %990 = vpow2.f32 %v280_v59  ;;  %v348_v37 = vadd.f32 1.0, %v1452_v18  ;;  %vm1471_vm2 = vcmp.lt.f32.partialorder %v309_v19, 0.0004427343  ;;  %v357_v42 = vadd.f32 1.0, %v1457_v23 }
  0x75   : > { %992 = vlog2.f32 %v330_v6  ;;  %v317_v46 = vmul.f32 %v1421_v47, %v316_v24  ;;  %v333_v48 = vmul.f32 -0.5, %v1429_v52  ;;  %v342_v44 = vmul.f32 -0.5, %v1437_v60 }
  0x76   : > { %872 = vmatpush3.bf16.xpose.msra.mxu1 %v871_v63  ;;  %994 = vlog2.f32 %v339_v16  ;;  %vm1481_vm3 = vcmp.lt.f32.partialorder %v318_v28, 0.0004427343  ;;  %v326_v55 = vmul.f32 %v1425_v50, %v325_v29  ;;  %vm1490_vm4 = vcmp.lt.f32.partialorder %v327_v36, 0.0004427343  ;;  %v1497_v50 = vld [vmem:[%s1360_s4 + $0x68] sm:$0xff] }
  0x77   : > { %873 = vmatprep.subr.bf16.mxu1 %v1178_v0  ;;  %996 = vpow2.f32 %v282_v21  ;;  %v284_v6 = vmul.f32 1.442695, %v257_v25  ;;  %v336_v9 = vand.u32 2147483647, %v1429_v52  ;;  %v343_v12 = vadd.f32 1.0, %v342_v44 }
  0x78   : > { %998 = vlog2.f32 %v348_v37  ;;  %v345_v16 = vand.u32 2147483647, %v1437_v60  ;;  %v351_v19 = vmul.f32 -0.5, %v1452_v18  ;;  %v360_v21 = vmul.f32 -0.5, %v1457_v23 }
  0x79   : > { %v981_v31 = vpop.eup %980  ;;  %1000 = vlog2.f32 %v357_v42  ;;  %v243_v25 = vand.u32 2147483647, %v1497_v50  ;;  %v344_v37 = vmul.f32 %v1437_v60, %v343_v12  ;;  %vm1523_vm5 = vcmp.lt.f32.partialorder %v336_v9, 0.0004427343  ;;  %v1538_v42 = vld [vmem:[%s1360_s4 + $0x70] sm:$0xff] }
  0x7a   : > { %v983_v38 = vpop.eup %982  ;;  %v296_v39 = vmul.f32 0.6931472, %v981_v31  ;;  %1002 = vpow2.f32 %v284_v6  ;;  %vm1527_vm6 = vcmp.lt.f32.partialorder %v345_v16, 0.0004427343  ;;  %v880_v60 = vpack.c.bf16 %v1497_v50, %v1450_v17 }
  0x7b   : > { %v985_v43 = vpop.eup %984  ;;  %v305_v45 = vmul.f32 0.6931472, %v983_v38  ;;  %v361_v38 = vadd.f32 1.0, %v360_v21  ;;  %v259_v11 = vsub.f32 0.0, %v243_v25  ;;  %v363_v44 = vand.u32 2147483647, %v1457_v23 }
  0x7c   : > { %v302_v49 = vsel %vm1464_vm1, %v299_v27, %v296_v39  ;;  %v314_v51 = vmul.f32 0.6931472, %v985_v43  ;;  %v987_v57 = vpop.eup %986  ;;  %v258_v27 = vsub.f32 0.0, %v242_v30  ;;  %v1541_v43 = vld [vmem:[%s1360_s4 + $0x78] sm:$0xff]  ;;  %v224_v12 = vmax.f32 %v1417_v41, 0.0 }
  0x7d   : > { %v311_v58 = vsel %vm1471_vm2, %v308_v33, %v305_v45  ;;  %v438_v47 = vadd.f32 %v302_v49, %v214_v53  ;;  %v1494_v63 = vpop.eup %988  ;;  %v323_v5 = vmul.f32 0.6931472, %v987_v57  ;;  %v334_v53 = vadd.f32 1.0, %v333_v48 }
  0x7e   : > { %v439_v1 = vadd.f32 %v311_v58, %v215_v61  ;;  %875 = vmatpush3.bf16.xpose.msra.mxu1 %v874_v20  ;;  %v1499_v7 = vpop.eup %990  ;;  %v320_v2 = vsel %vm1481_vm3, %v317_v46, %v314_v51  ;;  %v366_v24 = vadd.f32 1.0, %v1494_v63  ;;  %v286_v40 = vmul.f32 1.442695, %v258_v27 }
  0x7f   : > { %876 = vmatprep.subr.bf16.mxu1 %v1178_v0  ;;  %v993_v3 = vpop.eup %992  ;;  %v329_v61 = vsel %vm1490_vm4, %v326_v55, %v323_v5  ;;  %v440_v28 = vadd.f32 %v320_v2, %v216_v62  ;;  %v375_v31 = vadd.f32 1.0, %v1499_v7  ;;  %v335_v33 = vmul.f32 %v1429_v52, %v334_v53 }
  0x80   : > { %v838_v13 = vpack.c.bf16 %v439_v1, %v438_v47  ;;  %v995_v20 = vpop.eup %994  ;;  %v441_v29 = vadd.f32 %v329_v61, %v217_v10  ;;  %v332_v32 = vmul.f32 0.6931472, %v993_v3  ;;  %v352_v10 = vadd.f32 1.0, %v351_v19 }
  0x81   : > { %v341_v36 = vmul.f32 0.6931472, %v995_v20  ;;  %v1520_v30 = vpop.eup %996  ;;  %v219_v52 = vmax.f32 %v1390_v14, 0.0  ;;  %1004 = vlog2.f32 %v366_v24  ;;  %v354_v48 = vand.u32 2147483647, %v1452_v18 }
  0x82   : > { %839 = vmatpush3.bf16.xpose.msra.mxu0 %v838_v13  ;;  %v841_v39 = vpack.c.bf16 %v441_v29, %v440_v28  ;;  %1006 = vlog2.f32 %v375_v31  ;;  %v999_v45 = vpop.eup %998  ;;  %v338_v14 = vsel %vm1523_vm5, %v335_v33, %v332_v32  ;;  %v353_v49 = vmul.f32 %v1452_v18, %v352_v10 }
  0x83   : > { %840 = vmatprep.subr.bf16.mxu0 %v1178_v0  ;;  %v347_v46 = vsel %vm1527_vm6, %v344_v37, %v341_v36  ;;  %v369_v51 = vmul.f32 -0.5, %v1494_v63  ;;  %1008 = vpow2.f32 %v286_v40  ;;  %v288_v54 = vmul.f32 1.442695, %v259_v11 }
  0x84   : > { %v362_v55 = vmul.f32 %v1457_v23, %v361_v38  ;;  %v378_v57 = vmul.f32 -0.5, %v1499_v7  ;;  %v244_v58 = vand.u32 2147483647, %v1538_v42  ;;  %v245_v47 = vand.u32 2147483647, %v1541_v43 }
  0x85   : > { %v442_v59 = vadd.f32 %v338_v14, %v218_v4  ;;  %v443_v1 = vadd.f32 %v347_v46, %v219_v52  ;;  %v384_v5 = vadd.f32 1.0, %v1520_v30  ;;  %1010 = vpow2.f32 %v288_v54 }
  0x86   : > { %878 = vmatpush3.bf16.xpose.msra.mxu1 %v877_v26  ;;  %v1001_v26 = vpop.eup %1000  ;;  %v350_v18 = vmul.f32 0.6931472, %v999_v45  ;;  %v260_v2 = vsub.f32 0.0, %v244_v58  ;;  %v261_v53 = vsub.f32 0.0, %v245_v47  ;;  %v220_v23 = vmax.f32 %v1393_v15, 0.0 }
  0x87   : > { %879 = vmatprep.subr.bf16.mxu1 %v1178_v0  ;;  %v359_v6 = vmul.f32 0.6931472, %v1001_v26  ;;  %v1558_v9 = vpop.eup %1002  ;;  %vm1561_vm7 = vcmp.lt.f32.partialorder %v354_v48, 0.0004427343  ;;  %vm1565_vm8 = vcmp.lt.f32.partialorder %v363_v44, 0.0004427343  ;;  %v844_v20 = vpack.c.bf16 %v443_v1, %v442_v59 }
  0x88   : > { %v221_v13 = vmax.f32 %v1399_v22, 0.0  ;;  %v370_v61 = vadd.f32 1.0, %v369_v51  ;;  %v393_v16 = vadd.f32 1.0, %v1558_v9  ;;  %v290_v19 = vmul.f32 1.442695, %v260_v2  ;;  %v524_v59 = vld [vmem:[#allocation2] sm:$0xff] }
  0x89   : > { %v379_v21 = vadd.f32 1.0, %v378_v57  ;;  %1012 = vlog2.f32 %v384_v5  ;;  %v292_v24 = vmul.f32 1.442695, %v261_v53  ;;  %v356_v25 = vsel %vm1561_vm7, %v353_v49, %v350_v18 }
  0x8a   : > { %842 = vmatpush3.bf16.xpose.msra.mxu0 %v841_v39  ;;  %v365_v27 = vsel %vm1565_vm8, %v362_v55, %v359_v6  ;;  %1014 = vlog2.f32 %v393_v16  ;;  %v372_v28 = vand.u32 2147483647, %v1494_v63  ;;  %v381_v29 = vand.u32 2147483647, %v1499_v7 }
  0x8b   : > { %843 = vmatprep.subr.bf16.mxu0 %v1178_v0  ;;  %v1005_v15 = vpop.eup %1004  ;;  %1016 = vpow2.f32 %v290_v19  ;;  %v371_v31 = vmul.f32 %v1494_v63, %v370_v61  ;;  %v387_v32 = vmul.f32 -0.5, %v1520_v30  ;;  %v444_v36 = vadd.f32 %v356_v25, %v220_v23 }
  0x8c   : > { %v1007_v22 = vpop.eup %1006  ;;  %1018 = vpow2.f32 %v292_v24  ;;  %v445_v37 = vadd.f32 %v365_v27, %v221_v13  ;;  %v380_v4 = vmul.f32 %v1499_v7, %v379_v21  ;;  %v883_v8 = vpack.c.bf16 %v1541_v43, %v1538_v42 }
  0x8d   : > { %v1580_v33 = vpop.eup %1008  ;;  %v368_v62 = vmul.f32 0.6931472, %v1005_v15  ;;  %v377_v10 = vmul.f32 0.6931472, %v1007_v22  ;;  %v396_v52 = vmul.f32 -0.5, %v1558_v9  ;;  %v388_v7 = vadd.f32 1.0, %v387_v32 }
  0x8e   : > { %881 = vmatpush3.bf16.xpose.msra.mxu1 %v880_v60  ;;  %v402_v63 = vadd.f32 1.0, %v1580_v33  ;;  %vm1588_vm9 = vcmp.lt.f32.partialorder %v372_v28, 0.0004427343  ;;  %vm1592_vm10 = vcmp.lt.f32.partialorder %v381_v29, 0.0004427343  ;;  %v847_v40 = vpack.c.bf16 %v445_v37, %v444_v36 }
  0x8f   : > { %882 = vmatprep.subr.bf16.mxu1 %v1178_v0  ;;  %v1011_v38 = vpop.eup %1010  ;;  %v222_v45 = vmax.f32 %v1406_v34, 0.0  ;;  %v223_v14 = vmax.f32 %v1409_v35, 0.0  ;;  %v374_v46 = vsel %vm1588_vm9, %v371_v31, %v368_v62  ;;  %v383_v48 = vsel %vm1592_vm10, %v380_v4, %v377_v10 }
  0x90   : > { %v411_v11 = vadd.f32 1.0, %v1011_v38  ;;  %1020 = vlog2.f32 %v402_v63  ;;  %v397_v44 = vadd.f32 1.0, %v396_v52  ;;  %v390_v49 = vand.u32 2147483647, %v1520_v30 }
  0x91   : > { %v399_v51 = vand.u32 2147483647, %v1558_v9  ;;  %v389_v34 = vmul.f32 %v1520_v30, %v388_v7  ;;  %v446_v35 = vadd.f32 %v374_v46, %v222_v45  ;;  %v447_v57 = vadd.f32 %v383_v48, %v223_v14 }
  0x92   : > { %845 = vmatpush3.bf16.xpose.msra.mxu0 %v844_v20  ;;  %1022 = vlog2.f32 %v411_v11  ;;  %v405_v58 = vmul.f32 -0.5, %v1580_v33  ;;  %v414_v47 = vmul.f32 -0.5, %v1011_v38  ;;  %v398_v6 = vmul.f32 %v1558_v9, %v397_v44 }
  0x93   : > { %846 = vmatprep.subr.bf16.mxu0 %v1178_v0  ;;  %v1013_v26 = vpop.eup %1012  ;;  %vm1608_vm11 = vcmp.lt.f32.partialorder %v390_v49, 0.0004427343  ;;  %vm1612_vm12 = vcmp.lt.f32.partialorder %v399_v51, 0.0004427343  ;;  %v225_v3 = vmax.f32 %v1433_v56, 0.0  ;;  %v850_v13 = vpack.c.bf16 %v447_v57, %v446_v35 }
  0x94   : > { %v1015_v54 = vpop.eup %1014  ;;  %v386_v5 = vmul.f32 0.6931472, %v1013_v26  ;;  %v406_v61 = vadd.f32 1.0, %v405_v58  ;;  %v415_v16 = vadd.f32 1.0, %v414_v47  ;;  %v408_v21 = vand.u32 2147483647, %v1580_v33 }
  0x95   : > { %v1017_v55 = vpop.eup %1016  ;;  %v395_v18 = vmul.f32 0.6931472, %v1015_v54  ;;  %v417_v24 = vand.u32 2147483647, %v1011_v38  ;;  %v226_v36 = vmax.f32 %v1450_v17, 0.0  ;;  %v227_v37 = vmax.f32 %v1497_v50, 0.0 }
  0x96   : > { %884 = vmatpush3.bf16.xpose.msra.mxu1 %v883_v8  ;;  %v1019_v1 = vpop.eup %1018  ;;  %v420_v2 = vadd.f32 1.0, %v1017_v55  ;;  %v392_v9 = vsel %vm1608_vm11, %v389_v34, %v386_v5  ;;  %v407_v25 = vmul.f32 %v1580_v33, %v406_v61  ;;  %v416_v27 = vmul.f32 %v1011_v38, %v415_v16 }
  0x97   : > { %v429_v23 = vadd.f32 1.0, %v1019_v1  ;;  %v401_v19 = vsel %vm1612_vm12, %v398_v6, %v395_v18  ;;  %v448_v41 = vadd.f32 %v392_v9, %v224_v12  ;;  %v423_v29 = vmul.f32 -0.5, %v1017_v55 }
  0x98   : > { %1024 = vlog2.f32 %v420_v2  ;;  %v449_v56 = vadd.f32 %v401_v19, %v225_v3  ;;  %v432_v31 = vmul.f32 -0.5, %v1019_v1  ;;  %vm409_vm13 = vcmp.lt.f32.partialorder %v408_v21, 0.0004427343 }
  0x99   : > { %1026 = vlog2.f32 %v429_v23  ;;  %vm418_vm14 = vcmp.lt.f32.partialorder %v417_v24, 0.0004427343  ;;  %v424_v10 = vadd.f32 1.0, %v423_v29  ;;  %v426_v63 = vand.u32 2147483647, %v1017_v55 }
  0x9a   : > { %848 = vmatpush3.bf16.xpose.msra.mxu0 %v847_v40  ;;  %v1021_v20 = vpop.eup %1020  ;;  %v853_v32 = vpack.c.bf16 %v449_v56, %v448_v41  ;;  %v433_v52 = vadd.f32 1.0, %v432_v31  ;;  %v435_v38 = vand.u32 2147483647, %v1019_v1  ;;  %v228_v50 = vmax.f32 %v1538_v42, 0.0 }
  0x9b   : > { %849 = vmatprep.subr.bf16.mxu0 %v1178_v0  ;;  %v404_v22 = vmul.f32 0.6931472, %v1021_v20  ;;  %v425_v11 = vmul.f32 %v1017_v55, %v424_v10  ;;  %vm427_vm15 = vcmp.lt.f32.partialorder %v426_v63, 0.0004427343  ;;  %v229_v14 = vmax.f32 %v1541_v43, 0.0 }
  0x9c   : > { %v1023_v15 = vpop.eup %1022  ;;  %v434_v45 = vmul.f32 %v1019_v1, %v433_v52  ;;  %vm436_vm0 = vcmp.lt.f32.partialorder %v435_v38, 0.0004427343  ;;  %v1181_v51 = vmov 1.0  }
  0x9d   : > { %835 = vmatmul.mubr.f32.vlgmr.msra.gmra.mrb[0].mxu1 %v524_v59  ;;  %v413_v28 = vmul.f32 0.6931472, %v1023_v15  ;;  %v410_v8 = vsel %vm409_vm13, %v407_v25, %v404_v22 }
  0x9e   : > { %v450_v60 = vadd.f32 %v410_v8, %v226_v36 }
  0x9f   : > { %v419_v62 = vsel %vm418_vm14, %v416_v27, %v413_v28 }
  0xa0   : > { %v451_v39 = vadd.f32 %v419_v62, %v227_v37 }
  0xa2   : > { %851 = vmatpush3.bf16.xpose.msra.mxu0 %v850_v13  ;;  %v1025_v4 = vpop.eup %1024  ;;  %v856_v17 = vpack.c.bf16 %v451_v39, %v450_v60 }
  0xa3   : > { %852 = vmatprep.subr.bf16.mxu0 %v1178_v0  ;;  %v1027_v33 = vpop.eup %1026  ;;  %v422_v7 = vmul.f32 0.6931472, %v1025_v4 }
  0xa4   : > { %v431_v40 = vmul.f32 0.6931472, %v1027_v33 }
  0xa5   : > { %v428_v46 = vsel %vm427_vm15, %v425_v11, %v422_v7 }
  0xa6   : > { %v437_v48 = vsel %vm436_vm0, %v434_v45, %v431_v40  ;;  %v452_v44 = vadd.f32 %v428_v46, %v228_v50 }
  0xa7   : > { %v453_v26 = vadd.f32 %v437_v48, %v229_v14 }
  0xa9   : > { %v859_v49 = vpack.c.bf16 %v453_v26, %v452_v44 }
  0xaa   : > { %854 = vmatpush3.bf16.xpose.msra.mxu0 %v853_v32 }
  0xab   : > { %855 = vmatprep.subr.bf16.mxu0 %v1178_v0 }
  0xb2   : > { %857 = vmatpush3.bf16.xpose.msra.mxu0 %v856_v17 }
  0xb3   : > { %858 = vmatprep.subr.bf16.mxu0 %v1178_v0 }
  0xba   : > { %860 = vmatpush3.bf16.xpose.msra.mxu0 %v859_v49 }
  0xc1   : > { %800 = vmatmul.mubr.f32.vlgmr.msra.gmra.mrb[0].mxu0 %v1181_v51 }
 0x170   : > { %v591_v54 = vpop.f32.mrb[0].mxu1 }
 0x171   : > { %v836_v34 = vpop.f32.mrb[1].mxu1 }
 0x194   : > { %v520_v42 = vpop.f32.mrb[0].mxu0 }
 0x195   : > { %v595_v43 = vsub.f32 %v520_v42, %v591_v54  ;;  %v801_v55 = vpop.f32.mrb[1].mxu0 }
 0x197   : > { %600 = vst [vmem:[%s196_s23] sm:$0xff] %v595_v43 }
 0x198   : > { %1099 = shalt.err (!%p1096_p7)
}
 0x199   : > { %s1100_s6 = scalar_lea.hbm %s1636_s29, 128  ;;  %s1104_s19 = scalar_lea.hbm %s1687_s2, 256 }
 0x19a   : > { %p1101_p13 = scmp.ne.s32.totalorder %s1636_s29, %s1100_s6  ;;  %p1105_p12 = scmp.lt.u32.totalorder %s1636_s29, %s1687_s2 }
 0x19b   : > { %p1106_p4 = scmp.lt.u32.totalorder %s1104_s19, %s1100_s6  ;;  %p1108_p5 = scmp.lt.u32.totalorder %s1100_s6, %s1636_s29 }
 0x19c   : > { %p1102_p2 = pnand %p1101_p13, %p1732_p10 }
 0x19d   : > { %p1107_p8 = por %p1106_p4, %p1105_p12 }
 0x19e   : > { %p1103_p6 = pneg %p1102_p2 }
 0x19f   : > { %p1109_p11 = por %p1108_p5, %p1107_p8 }
 0x1a1   : > { %p1110_p1 = pnand %p1109_p11, %p1103_p6 }
 0x1a3   : > { %1113 = shalt.err (!%p1110_p1)
}
 0x1a4   : > { %891 = dma.vmem_to_hbm [thread:$0]  (%p1732_p10), %s1638_s26, 128, %s1636_s29, %s609_s5  }
 0x1a5 PF: > { %s634_s4 = sand.u32 1, %s1152_s9   ;;  %p1733_p0 = scmp.ne.s32.totalorder %s1698_s22, 0 }
 0x1a6   : > { %p1734_p9 = scmp.ge.s32.totalorder %s1172_s14, 2  ;;  %s635_s18 = scalar_lea.sflag [#allocation4], %s634_s4 }
 0x1a8   : > { %p902_p3 = pnand %p1734_p9, %p1733_p0 }
 0x1aa   : > { %1147 = dma.done.wait (!%p902_p3), %s635_s18, 128  }
 0x1ab   : > { %1149 = vsyncadd (!%p902_p3), %s635_s18, 4294967168  ;;  %s19_s14 = sadd.s32 1, %s1172_s14   ;;  %s1735_s9 = smov %s1156_s10 }
 0x1ac   : > { %p16_p7 = scmp.ge.s32.totalorder %s19_s14, 4   ;;  %s1736_s10 = smov %s1160_s11 }
 0x1ad   : > { %s1737_s11 = smov %s1317_s25  ;;  %s1738_s12 = smov %s1168_s13 }
 0x1ae   : > { %s1739_s13 = smov %s1741_s28  ;;  %18 = sbr.rel (!%p16_p7) target bundleno = 7 (0x7), region = 87 }
 0x1b5   :  { %640 = vsyncpa [#allocation3], 1 }
 0x1b6   :  { %642 = vsyncpa [#allocation3 + $0x1], 1 }
 0x1b7   :  { %643 = vsyncpa [#allocation6], 1 }
 0x1b8   :  { %645 = vsyncpa [#allocation6 + $0x1], 1 }
 0x1b9   :  { %646 = vsyncpa [#allocation4], 1 }
 0x1ba   :  { %648 = vsyncpa [#allocation4 + $0x1], 1 }

</bundles_post_ra>
